<compile_context>
chip_gen: v7x
topology: tpu7x:2x2x1
jax: 0.10.0
libtpu: 0.0.40
codegen_flags: <defaults>
</compile_context>

<pallas_src>
import functools

import jax
import jax.numpy as jnp
from jax.experimental import pallas as pl
from jax.experimental.pallas import tpu as pltpu


_MAX_BLOCK_BYTES = 8 * 1024 * 1024  # diminishing returns beyond ~8 MiB per streamed block


# ----------------------------------------------------------------------------
# Per-generation VMEM / tile budgets
# ----------------------------------------------------------------------------
def _vmem_capacity_bytes():
    try:
        info = pltpu.get_tpu_info()
        for attr in ("vmem_capacity_bytes", "vmem_size_bytes", "vmem_bytes"):
            v = getattr(info, attr, None)
            if v:
                return int(v)
    except Exception:
        pass
    return 64 * 1024 * 1024  # conservative default (v7x physical size)


def _vmem_limit_bytes():
    cap = _vmem_capacity_bytes()
    if cap >= 100 * 1024 * 1024:          # v5e / v6e: 128 MiB physical
        return 96 * 1024 * 1024
    return min(48 * 1024 * 1024, (cap * 3) // 4)   # v7x: 64 MiB physical


def _block_byte_cap(vmem_limit, n_image_streams):
    # Roughly half the scoped limit goes to the double-buffered image-stream blocks.
    cap = (vmem_limit // 2) // (2 * n_image_streams)
    return max(64 * 1024, min(_MAX_BLOCK_BYTES, cap))


def _channels_per_block(c, rows_per_chan, byte_cap):
    """Largest k dividing C whose (k*rows_per_chan, 128) f32 block fits `byte_cap`
    and whose sublane extent is 8-aligned (or equals the full row extent)."""
    bytes_per_chan = rows_per_chan * 128 * 4
    for k in range(c, 0, -1):
        if c % k:
            continue
        if k != c and (k * rows_per_chan) % 8 != 0:
            continue
        if k * bytes_per_chan <= byte_cap:
            return k
    for k in range(1, c + 1):  # nothing fits: smallest legal block, best effort
        if c % k == 0 and (k == c or (k * rows_per_chan) % 8 == 0):
            return k
    return c


# ----------------------------------------------------------------------------
# Layout helpers: [N, C, H, W]  <->  [N, C*HW_pad/128, 128]  (channel-major rows)
# ----------------------------------------------------------------------------
def _to_rows(img):
    n, c, h, w = img.shape
    hw = h * w
    hw_pad = ((hw + 127) // 128) * 128
    flat = img.astype(jnp.float32).reshape(n, c, hw)
    if hw_pad != hw:
        flat = jnp.pad(flat, ((0, 0), (0, 0), (0, hw_pad - hw)))
    return flat.reshape(n, (c * hw_pad) // 128, 128)


def _from_rows(rows, c, h, w):
    n = rows.shape[0]
    hw = h * w
    hw_pad = (rows.shape[1] * 128) // c
    return rows.reshape(n, c, hw_pad)[:, :, :hw].reshape(n, c, h, w)


# ----------------------------------------------------------------------------
# Kernel 1: "feature extractor" (per-channel global avg-pool) + fc + log-softmax
#   grid = (batch [parallel], channel groups [arbitrary])
# ----------------------------------------------------------------------------
def _policy_kernel(x_ref, w_ref, b_ref, feats_ref, logp_ref, acc_ref,
                   *, k, rpc, inv_hw):
    g = pl.program_id(1)
    x = x_ref[...].astype(jnp.float32)                 # (1, k*rpc, 128)
    partial = jnp.sum(x.reshape(k, rpc, 128), axis=1)  # (k, 128) -- VPU adds, no lane reduce
    acc_ref[pl.ds(g * k, k), :] = partial              # complete sums for this channel group

    @pl.when(g == pl.num_programs(1) - 1)
    def _():
        c = feats_ref.shape[-1]
        a = logp_ref.shape[-1]
        # single cross-lane reduce at finalize, then tiny fc + log-softmax
        feats = jnp.sum(acc_ref[...].reshape(1, c, 128), axis=-1) * inv_hw   # (1, C)
        logits = jnp.dot(feats, w_ref[...],
                         preferred_element_type=jnp.float32) + b_ref[...]   # (1, A)
        m = jnp.max(logits, axis=-1, keepdims=True)
        lse = jnp.log(jnp.sum(jnp.exp(logits - m), axis=-1, keepdims=True))
        feats_ref[...] = feats.reshape(1, 1, c)
        logp_ref[...] = (logits - m - lse).reshape(1, 1, a)


def policy_head(x_rows, w_fc, b_fc, hw_true):
    B, n_rows, _ = x_rows.shape
    C, A = w_fc.shape
    rpc = n_rows // C
    vmem_limit = _vmem_limit_bytes()
    k = _channels_per_block(C, rpc, _block_byte_cap(vmem_limit, n_image_streams=1))
    Rg = k * rpc
    n_g = C // k

    kernel = functools.partial(_policy_kernel, k=k, rpc=rpc, inv_hw=1.0 / float(hw_true))
    grid_spec = pltpu.PrefetchScalarGridSpec(
        num_scalar_prefetch=0,
        grid=(B, n_g),
        in_specs=[
            pl.BlockSpec((1, Rg, 128), lambda b, g: (b, g, 0)),
            pl.BlockSpec((C, A), lambda b, g: (0, 0)),
            pl.BlockSpec((1, A), lambda b, g: (0, 0)),
        ],
        out_specs=[
            pl.BlockSpec((1, 1, C), lambda b, g: (b, 0, 0)),
            pl.BlockSpec((1, 1, A), lambda b, g: (b, 0, 0)),
        ],
        scratch_shapes=[pltpu.VMEM((C, 128), jnp.float32)],
    )
    feats, log_probs = pl.pallas_call(
        kernel,
        grid_spec=grid_spec,
        out_shape=(
            jax.ShapeDtypeStruct((B, 1, C), jnp.float32),
            jax.ShapeDtypeStruct((B, 1, A), jnp.float32),
        ),
        compiler_params=pltpu.CompilerParams(
            dimension_semantics=("parallel", "arbitrary"),
            vmem_limit_bytes=vmem_limit,
        ),
    )(x_rows, w_fc, b_fc)
    return feats[:, 0, :], log_probs[:, 0, :]


# ----------------------------------------------------------------------------
# Kernel 2: fused background gather + adversarial_fusion + clamp + adversarial pool
#   x_adv = clamp(gamma*x + (1-gamma)*bg[actions], x - eps, x + eps)
#   f_adv = per-channel mean(x_adv)   (accumulated in the same pass)
#   `actions` is scalar-prefetched (SMEM) and drives the background index_map.
# ----------------------------------------------------------------------------
def _fused_adv_kernel(actions_ref, x_ref, bg_ref, xadv_ref, fadv_ref, acc_ref,
                      *, k, rpc, gamma, epsilon, inv_hw):
    del actions_ref  # only used inside the index_maps
    g = pl.program_id(1)
    x = x_ref[...].astype(jnp.float32)                  # (1, k*rpc, 128)
    bg = bg_ref[...].astype(jnp.float32)
    fused = gamma * x + (1.0 - gamma) * bg
    xadv = jnp.clip(fused, x - epsilon, x + epsilon)
    xadv_ref[...] = xadv.astype(xadv_ref.dtype)
    partial = jnp.sum(xadv.reshape(k, rpc, 128), axis=1)  # (k, 128)
    acc_ref[pl.ds(g * k, k), :] = partial

    @pl.when(g == pl.num_programs(1) - 1)
    def _():
        c = fadv_ref.shape[-1]
        fadv_ref[...] = (jnp.sum(acc_ref[...].reshape(1, c, 128), axis=-1)
                         * inv_hw).reshape(1, 1, c)


def fused_adversarial(x_rows, bg_rows, actions, gamma, epsilon, C, hw_true):
    B, n_rows, _ = x_rows.shape
    rpc = n_rows // C
    vmem_limit = _vmem_limit_bytes()
    # three image-sized streams are live (x in, bg in, x_adv out), each double-buffered
    k = _channels_per_block(C, rpc, _block_byte_cap(vmem_limit, n_image_streams=3))
    Rg = k * rpc
    n_g = C // k

    kernel = functools.partial(_fused_adv_kernel, k=k, rpc=rpc, gamma=float(gamma),
                               epsilon=float(epsilon), inv_hw=1.0 / float(hw_true))
    grid_spec = pltpu.PrefetchScalarGridSpec(
        num_scalar_prefetch=1,
        grid=(B, n_g),
        in_specs=[
            pl.BlockSpec((1, Rg, 128), lambda b, g, acts: (b, g, 0)),
            pl.BlockSpec((1, Rg, 128), lambda b, g, acts: (acts[b], g, 0)),
        ],
        out_specs=[
            pl.BlockSpec((1, Rg, 128), lambda b, g, acts: (b, g, 0)),
            pl.BlockSpec((1, 1, C), lambda b, g, acts: (b, 0, 0)),
        ],
        scratch_shapes=[pltpu.VMEM((C, 128), jnp.float32)],
    )
    x_adv_rows, f_adv = pl.pallas_call(
        kernel,
        grid_spec=grid_spec,
        out_shape=(
            jax.ShapeDtypeStruct((B, n_rows, 128), jnp.float32),
            jax.ShapeDtypeStruct((B, 1, C), jnp.float32),
        ),
        compiler_params=pltpu.CompilerParams(
            dimension_semantics=("parallel", "arbitrary"),
            vmem_limit_bytes=vmem_limit,
        ),
    )(actions, x_rows, bg_rows)
    return x_adv_rows, f_adv[:, 0, :]


# ----------------------------------------------------------------------------
# Full forward pass (mirrors mixer.forward)
# ----------------------------------------------------------------------------
def mixer_forward(params, x, y_true, background_images, idx, key,
                  *, epsilon, gamma, w1, w2):
    B, C, H, W = x.shape
    HW = H * W
    x_rows = _to_rows(x)
    bg_rows = _to_rows(background_images)

    # feature extraction (avg-pool) + fc + log-softmax (Pallas kernel 1)
    # TODO(synk): real resnet50 feature extractor replaced by avg-pool + linear head.
    feats, log_probs = policy_head(x_rows, params["w_fc"], params["b_fc"], HW)

    # Categorical sample + log_prob of sampled actions
    actions = jax.random.categorical(key, log_probs, axis=-1).astype(jnp.int32)   # [B]
    log_prob_a = jnp.take_along_axis(log_probs, actions[:, None], axis=-1)[:, 0]

    # fused background gather + adversarial fusion + clamp + adversarial pooling
    x_adv_rows, f_adv = fused_adversarial(x_rows, bg_rows, actions, gamma, epsilon, C, HW)

    # attack reward on pooled features (tiny: plain jnp so XLA fuses it with the loss)
    # TODO(synk): real pretrained surrogate model (1000-class) replaced by a synthetic
    # K-class linear classifier on the pooled features.
    out_orig = feats @ params["w_cls"] + params["b_cls"]
    out_adv = f_adv @ params["w_cls"] + params["b_cls"]
    z_y = jnp.take_along_axis(out_orig, y_true[:, None], axis=-1)[:, 0]
    z_hat_y = jnp.take_along_axis(out_adv, y_true[:, None], axis=-1)[:, 0]
    r_attack = jnp.mean(z_hat_y - z_y)

    # TODO(synk): R_transfer requires external pretrained target models; target_name is empty -> 0.0
    r_transfer = 0.0
    r_total = w1 * r_attack + w2 * r_transfer

    total_log_prob = jnp.sum(log_prob_a)
    loss = -total_log_prob * r_total
    x_adv = _from_rows(x_adv_rows, C, H, W)
    return loss, x_adv


# ----------------------------------------------------------------------------
if __name__ == "__main__":
    # small, module-consistent shapes
    B, C, H, W = 2, 4, 16, 16
    ACTION_DIM = 8          # number of background images to choose from
    NUM_CLASSES = 10        # synthetic surrogate classifier classes
    EPSILON = 0.1
    GAMMA = 0.7
    W1, W2 = 1.0, 0.5

    root = jax.random.PRNGKey(0)
    k_x, k_bg, k_y, k_wfc, k_bfc, k_wcls, k_bcls, k_sample = jax.random.split(root, 8)

    x = jax.random.normal(k_x, (B, C, H, W), dtype=jnp.float32)
    background_images = jax.random.normal(k_bg, (ACTION_DIM, C, H, W), dtype=jnp.float32)
    y_true = jax.random.randint(k_y, (B,), 0, NUM_CLASSES)

    params = {
        "w_fc": 0.1 * jax.random.normal(k_wfc, (C, ACTION_DIM), dtype=jnp.float32),
        "b_fc": 0.01 * jax.random.normal(k_bfc, (1, ACTION_DIM), dtype=jnp.float32),
        "w_cls": 0.1 * jax.random.normal(k_wcls, (C, NUM_CLASSES), dtype=jnp.float32),
        "b_cls": 0.01 * jax.random.normal(k_bcls, (1, NUM_CLASSES), dtype=jnp.float32),
    }

    loss, x_adv = mixer_forward(
        params, x, y_true, background_images, idx=0, key=k_sample,
        epsilon=EPSILON, gamma=GAMMA, w1=W1, w2=W2)

    jax.block_until_ready((loss, x_adv))
    assert x_adv.shape == (B, C, H, W)
    assert loss.shape == ()
    print("KERNEL_OK")
</pallas_src>

<mosaic_0001>
module attributes {stable_mosaic.version = 11 : i64} {
  func.func @_policy_kernel(%arg0: i32, %arg1: i32, %arg2: memref<1x8x128xf32, #tpu.memory_space<vmem>>, %arg3: memref<4x8xf32, #tpu.memory_space<vmem>>, %arg4: memref<1x8xf32, #tpu.memory_space<vmem>>, %arg5: memref<1x1x4xf32, #tpu.memory_space<vmem>>, %arg6: memref<1x1x8xf32, #tpu.memory_space<vmem>>, %arg7: memref<4x128xf32, #tpu.memory_space<vmem>>) attributes {dimension_semantics = [#tpu.dimension_semantics<parallel>, #tpu.dimension_semantics<arbitrary>], iteration_bounds = array<i64: 2, 1>, scalar_prefetch = 0 : i64, scratch_operands = 1 : i64, tpu.core_type = #tpu.core_type<tc>, window_params = [{transform_indices = @transform_0, window_bounds = array<i64: 1, 8, 128>}, {pipeline_mode = #tpu.pipeline_mode<synchronous>, transform_indices = @transform_1, window_bounds = array<i64: 4, 8>}, {pipeline_mode = #tpu.pipeline_mode<synchronous>, transform_indices = @transform_2, window_bounds = array<i64: 1, 8>}, {transform_indices = @transform_3, window_bounds = array<i64: 1, 1, 4>}, {transform_indices = @transform_4, window_bounds = array<i64: 1, 1, 8>}]} {
    %c0 = arith.constant 0 : index
    %c0_0 = arith.constant 0 : index
    %c0_1 = arith.constant 0 : index
    %0 = vector.load %arg2[%c0, %c0_0, %c0_1] : memref<1x8x128xf32, #tpu.memory_space<vmem>>, vector<1x8x128xf32>
    %1 = vector.shape_cast %0 : vector<1x8x128xf32> to vector<4x2x128xf32>
    %cst = arith.constant dense<0.000000e+00> : vector<4x128xf32>
    %2 = vector.multi_reduction <add>, %1, %cst [1] : vector<4x2x128xf32> to vector<4x128xf32>
    %c4_i32 = arith.constant 4 : i32
    %3 = arith.muli %arg1, %c4_i32 : i32
    %4 = arith.index_cast %3 : i32 to index
    %c0_2 = arith.constant 0 : index
    %5 = vector.load %arg7[%4, %c0_2] : memref<4x128xf32, #tpu.memory_space<vmem>>, vector<4x128xf32>
    tpu.vector_store %arg7[%4, %c0_2], %2 {strides = array<i32>} : memref<4x128xf32, #tpu.memory_space<vmem>>, vector<4x128xf32>,
    %c0_i32 = arith.constant 0 : i32
    %6 = arith.cmpi eq, %arg1, %c0_i32 : i32
    %7 = arith.extui %6 : i1 to i32
    %c0_i32_3 = arith.constant 0 : i32
    %8 = arith.cmpi ne, %7, %c0_i32_3 : i32
    scf.if %8 {
      %c0_4 = arith.constant 0 : index
      %c0_5 = arith.constant 0 : index
      %9 = vector.load %arg7[%c0_4, %c0_5] : memref<4x128xf32, #tpu.memory_space<vmem>>, vector<4x128xf32>
      %10 = vector.shape_cast %9 : vector<4x128xf32> to vector<1x4x128xf32>
      %cst_6 = arith.constant dense<0.000000e+00> : vector<1x4xf32>
      %11 = vector.multi_reduction <add>, %10, %cst_6 [2] : vector<1x4x128xf32> to vector<1x4xf32>
      %cst_7 = arith.constant 3.906250e-03 : f32
      %12 = vector.broadcast %cst_7 : f32 to vector<1x4xf32>
      %13 = arith.mulf %11, %12 : vector<1x4xf32>
      %c0_8 = arith.constant 0 : index
      %c0_9 = arith.constant 0 : index
      %14 = vector.load %arg3[%c0_8, %c0_9] : memref<4x8xf32, #tpu.memory_space<vmem>>, vector<4x8xf32>
      %cst_10 = arith.constant dense<0.000000e+00> : vector<1x8xf32>
      %15 = tpu.matmul %13, %14, %cst_10 {dimension_numbers = #tpu.dot_dimension_numbers<[1], [0], [0], [1], [0, 0, 1, 1], [], []>} : vector<1x4xf32>, vector<4x8xf32>, vector<1x8xf32> -> vector<1x8xf32>
      %c0_11 = arith.constant 0 : index
      %c0_12 = arith.constant 0 : index
      %16 = vector.load %arg4[%c0_11, %c0_12] : memref<1x8xf32, #tpu.memory_space<vmem>>, vector<1x8xf32>
      %17 = arith.addf %15, %16 : vector<1x8xf32>
      %cst_13 = arith.constant dense<0xFF800000> : vector<1xf32>
      %18 = vector.multi_reduction <maximumf>, %17, %cst_13 [1] : vector<1x8xf32> to vector<1xf32>
      %19 = vector.shape_cast %18 : vector<1xf32> to vector<1x1xf32>
      %20 = vector.broadcast %19 : vector<1x1xf32> to vector<1x8xf32>
      %21 = arith.subf %17, %20 : vector<1x8xf32>
      %22 = math.exp %21 : vector<1x8xf32>
      %cst_14 = arith.constant dense<0.000000e+00> : vector<1xf32>
      %23 = vector.multi_reduction <add>, %22, %cst_14 [1] : vector<1x8xf32> to vector<1xf32>
      %24 = vector.shape_cast %23 : vector<1xf32> to vector<1x1xf32>
      %25 = math.log %24 : vector<1x1xf32>
      %26 = vector.shape_cast %13 : vector<1x4xf32> to vector<1x1x4xf32>
      %c0_15 = arith.constant 0 : index
      %c0_16 = arith.constant 0 : index
      %c0_17 = arith.constant 0 : index
      %27 = vector.load %arg5[%c0_15, %c0_16, %c0_17] : memref<1x1x4xf32, #tpu.memory_space<vmem>>, vector<1x1x4xf32>
      tpu.vector_store %arg5[%c0_15, %c0_16, %c0_17], %26 {strides = array<i32>} : memref<1x1x4xf32, #tpu.memory_space<vmem>>, vector<1x1x4xf32>,
      %28 = vector.broadcast %19 : vector<1x1xf32> to vector<1x8xf32>
      %29 = arith.subf %17, %28 : vector<1x8xf32>
      %30 = vector.broadcast %25 : vector<1x1xf32> to vector<1x8xf32>
      %31 = arith.subf %29, %30 : vector<1x8xf32>
      %32 = vector.shape_cast %31 : vector<1x8xf32> to vector<1x1x8xf32>
      %c0_18 = arith.constant 0 : index
      %c0_19 = arith.constant 0 : index
      %c0_20 = arith.constant 0 : index
      %33 = vector.load %arg6[%c0_18, %c0_19, %c0_20] : memref<1x1x8xf32, #tpu.memory_space<vmem>>, vector<1x1x8xf32>
      tpu.vector_store %arg6[%c0_18, %c0_19, %c0_20], %32 {strides = array<i32>} : memref<1x1x8xf32, #tpu.memory_space<vmem>>, vector<1x1x8xf32>,
    } else {
    }
    return
  }
  func.func @transform_0(%arg0: i32, %arg1: i32) -> (i32, i32, i32) {
    %c0_i32 = arith.constant 0 : i32
    %c0_i32_0 = arith.constant 0 : i32
    return %arg0, %arg1, %c0_i32 : i32, i32, i32
  }
  func.func @transform_1(%arg0: i32, %arg1: i32) -> (i32, i32) {
    %c0_i32 = arith.constant 0 : i32
    %c0_i32_0 = arith.constant 0 : i32
    %c0_i32_1 = arith.constant 0 : i32
    return %c0_i32, %c0_i32_0 : i32, i32
  }
  func.func @transform_2(%arg0: i32, %arg1: i32) -> (i32, i32) {
    %c0_i32 = arith.constant 0 : i32
    %c0_i32_0 = arith.constant 0 : i32
    %c0_i32_1 = arith.constant 0 : i32
    return %c0_i32, %c0_i32_0 : i32, i32
  }
  func.func @transform_3(%arg0: i32, %arg1: i32) -> (i32, i32, i32) {
    %c0_i32 = arith.constant 0 : i32
    %c0_i32_0 = arith.constant 0 : i32
    %c0_i32_1 = arith.constant 0 : i32
    return %arg0, %c0_i32, %c0_i32_0 : i32, i32, i32
  }
  func.func @transform_4(%arg0: i32, %arg1: i32) -> (i32, i32, i32) {
    %c0_i32 = arith.constant 0 : i32
    %c0_i32_0 = arith.constant 0 : i32
    %c0_i32_1 = arith.constant 0 : i32
    return %arg0, %c0_i32, %c0_i32_0 : i32, i32, i32
  }
}

</mosaic_0001>

<bundles_post_ra>
// kernel: tpu_custom_call.1
= control target key start
LH: loop header
LB: loop body
LE: loop exit
PB: predicated region body
PF: predicated region fallthrough
CT: control target
= control target key end

     0   :  { %10 = vsyncpa [#allocation4], 0  ;;  %s1143_s0 = inlined_call_operand.hbm [shape: f32[2,8,128], index: 0, kind: input, shape index: {}]   ;;  %s1144_s1 = inlined_call_operand.hbm [shape: f32[4,8], index: 1, kind: input, shape index: {}]   ;;  %s1145_s2 = inlined_call_operand.vmem [shape: f32[1,8], index: 2, kind: input, shape index: {}]   ;;  %s1146_s3 = inlined_call_operand.hbm [shape: f32[2,1,4], index: 3, kind: output, shape index: {0}]   ;;  %s1147_s4 = inlined_call_operand.hbm [shape: f32[2,1,8], index: 4, kind: output, shape index: {1}]  }
   0x1   :  { %12 = vsyncpa [#allocation4 + $0x1], 0 }
   0x2   :  { %13 = vsyncpa [#allocation7], 0 }
   0x3   :  { %14 = vsyncpa [#allocation5], 0 }
   0x4   :  { %16 = vsyncpa [#allocation5 + $0x1], 0 }
   0x5   :  { %17 = vsyncpa [#allocation10], 0 }
   0x6   :  { %19 = vsyncpa [#allocation10 + $0x1], 0  ;;  %s892_s15 = smov 0   ;;  %s894_s16 = smov 0  }
   0x7   :  { %s896_s17 = smov 0   ;;  %s898_s18 = smov 0  }
   0x8   :  { %s900_s19 = smov 0   ;;  %s902_s20 = smov 0  }
   0x9 LB: > { %s573_s21 = sadd.s32 4294967295, %s858_s20   ;;  %s574_s22 = sadd.s32 4294967294, %s858_s20   ;;  %s858_s20 = sphi %s902_s20, %s25_s20   ;;  %s854_s19 = sphi %s900_s19, %s1172_s19   ;;  %s850_s18 = sphi %s898_s18, %s1171_s18   ;;  %s846_s17 = sphi %s896_s17, %s1170_s17   ;;  %s842_s16 = sphi %s894_s16, %s1169_s16   ;;  %s838_s15 = sphi %s892_s15, %s1168_s15  }
   0xa   : > { %p59_p0 = scmp.ne.s32.totalorder %s842_s16, %s838_s15  ;;  %p926_p1 = scmp.eq.s32.totalorder %s573_s21, 0 }
   0xb   : > { %p930_p2 = scmp.eq.s32.totalorder %s573_s21, 1  ;;  %p131_p3 = scmp.eq.s32.totalorder %s574_s22, 1 }
   0xc   : > { %s1152_s23 = scalar_select %p926_p1, 1, 0 }
   0xd   : > { %s1153_s24 = scalar_select %p930_p2, 1, 0 }
   0xe   : > { %p936_p4 = por %p926_p1, %p59_p0  ;;  %p575_p5 = scmp.ge.s32.totalorder %s858_s20, 1 }
   0xf   : > { %p941_p6 = por %p131_p3, %p59_p0  ;;  %p164_p7 = scmp.lt.s32.totalorder %s858_s20, 3 }
  0x10   : > { %s1154_s25 = scalar_select %p936_p4, 1, 0 }
  0x11   : > { %s1155_s26 = scalar_select %p941_p6, 1, 0 }
  0x12   : > { %p946_p8 = pnand %p575_p5, %p164_p7  ;;  %s860_s28 = smov [#allocation6]  }
  0x13   : > { %s177_s29 = sshll.u32 %s860_s28, 4  ;;  %s37_s5 = sadd.s32 1, %s854_s19  ;;  %s178_s29 = int_to_ptr.vmem [resolvable:$true] %s177_s29 }
  0x14   : > { %s1156_s27 = scalar_select %p946_p8, 1, 0 }
  0x15   : > { %p606_p10 = pneg %p946_p8  ;;  %s46_s6 = sadd.s32 1, %s846_s17 }
  0x16   : > { %p961_p12 = scmp.ge.s32.totalorder %s37_s5, 2  ;;  %s682_s10 = scalar_lea.hbm %s1144_s1, 64 }
  0x17   : > { %p955_p11 = pnand %p606_p10, %p926_p1  ;;  %p683_p13 = scmp.ne.s32.totalorder %s1144_s1, %s682_s10 }
  0x18   : > { %s1158_s7 = scalar_select %p961_p12, 1, 0 }
  0x19   : > { %p684_p0 = pneg %p955_p11  ;;  %p689_p7 = scmp.lt.u32.totalorder %s682_s10, %s1144_s1 }
  0x1b   : > { %p685_p3 = pnand %p684_p0, %p683_p13 }
  0x1d   : > { %p686_p5 = pneg %p685_p3 }
  0x1f   : > { %p691_p10 = pnand %p689_p7, %p686_p5 }
  0x21   : > { %694 = shalt.err (!%p691_p10)
}
  0x22   : > { %s695_s21 = scalar_lea.vmem %s178_s29, 64  ;;  %p703_p4 = scmp.lt.s32.totalorder %s178_s29, %s178_s29 }
  0x23   : > { %p696_p9 = scmp.ne.s32.totalorder %s178_s29, %s695_s21  ;;  %p704_p8 = scmp.lt.s32.totalorder %s695_s21, %s695_s21 }
  0x25   : > { %p698_p6 = pnand %p696_p9, %p684_p0  ;;  %p705_p2 = por %p704_p8, %p703_p4 }
  0x27   : > { %p699_p1 = pneg %p698_p6 }
  0x29   : > { %p706_p12 = pnand %p705_p2, %p699_p1 }
  0x2b   : > { %709 = shalt.err (!%p706_p12)
}
  0x2c   : > { %609 = dma.hbm_to_vmem [thread:$0]  (!%p955_p11), %s1144_s1, 64, %s178_s29, [#allocation7]  }
  0x2d   : > { %p1159_p4 = scmp.ne.s32.totalorder %s1158_s7, 0  ;;  %p53_p1 = scmp.ne.s32.totalorder %s846_s17, %s842_s16 }
  0x2e   : > { %p54_p2 = scmp.eq.s32.totalorder %s858_s20, 0  ;;  %p622_p6 = scmp.lt.s32.totalorder %s858_s20, 2 }
  0x2f   : > { %s1174_s5 = smov (%p1159_p4, %s37_s5), 0  ;;  %p1160_p12 = scmp.ne.s32.totalorder %s1153_s24, 0 }
  0x30   : > { %s41_s30 = ssub.s32 %s854_s19, %s1174_s5  ;;  %p55_p9 = por %p54_p2, %p53_p1 }
  0x31   : > { %p44_p8 = scmp.eq.s32.totalorder %s41_s30, 0  ;;  %p993_p13 = por %p1160_p12, %p53_p1 }
  0x32   : > { %s191_s9 = sand.u32 1, %s846_s17   ;;  %s579_s7 = sshll.u32 %s854_s19, 7 }
  0x33   : > { %s1001_s10 = scalar_select %p44_p8, %s846_s17, %s46_s6  }
  0x34   : > { %s578_s29 = sshll.u32 %s191_s9, 3  ;;  %s1007_s13 = scalar_lea.hbm %s1143_s0, %s579_s7 }
  0x35   : > { %s195_s24 = scalar_lea.vmem [#allocation3], %s578_s29  ;;  %p1011_p11 = pnand %p622_p6, %p55_p9 }
  0x36   : > { %s203_s14 = sshll.u32 %s195_s24, 4  ;;  %s192_s6 = scalar_lea.sflag [#allocation4], %s191_s9  ;;  %s1009_s14 = int_to_ptr.vmem [resolvable:$true] %s203_s14 }
  0x37   : > { %s710_s22 = scalar_lea.hbm %s1007_s13, 128  ;;  %p712_p3 = pneg %p1011_p11 }
  0x38   : > { %p711_p0 = scmp.ne.s32.totalorder %s1007_s13, %s710_s22  ;;  %s715_s29 = scalar_lea.hbm %s1143_s0, 256 }
  0x39   : > { %p716_p10 = scmp.lt.u32.totalorder %s1007_s13, %s1143_s0  ;;  %p717_p4 = scmp.lt.u32.totalorder %s715_s29, %s710_s22 }
  0x3a   : > { %p713_p5 = pnand %p712_p3, %p711_p0  ;;  %p719_p2 = scmp.lt.u32.totalorder %s710_s22, %s1007_s13 }
  0x3b   : > { %p718_p1 = por %p717_p4, %p716_p10 }
  0x3c   : > { %p714_p7 = pneg %p713_p5 }
  0x3d   : > { %p720_p6 = por %p719_p2, %p718_p1 }
  0x3f   : > { %p721_p8 = pnand %p720_p6, %p714_p7 }
  0x41   : > { %724 = shalt.err (!%p721_p8)
}
  0x42   : > { %s725_s9 = scalar_lea.vmem %s1009_s14, 128  ;;  %s861_s12 = smov [#allocation3]  }
  0x43   : > { %p726_p9 = scmp.ne.s32.totalorder %s1009_s14, %s725_s9  ;;  %s730_s24 = sshll.u32 %s861_s12, 4  ;;  %s731_s24 = int_to_ptr.vmem [resolvable:$false] %s730_s24 }
  0x44   : > { %s732_s28 = scalar_lea.vmem %s731_s24, 256  ;;  %p733_p5 = scmp.lt.s32.totalorder %s1009_s14, %s731_s24 }
  0x45   : > { %p728_p12 = pnand %p726_p9, %p712_p3  ;;  %p734_p10 = scmp.lt.s32.totalorder %s732_s28, %s725_s9 }
  0x47   : > { %p729_p0 = pneg %p728_p12  ;;  %p735_p4 = por %p734_p10, %p733_p5 }
  0x49   : > { %p736_p1 = pnand %p735_p4, %p729_p0 }
  0x4b   : > { %739 = shalt.err (!%p736_p1)
}
  0x4c   : > { %613 = dma.hbm_to_vmem [thread:$0]  (!%p1011_p11), %s1007_s13, 128, %s1009_s14, %s192_s6  }
  0x4d   : > { %p1163_p7 = scmp.ne.s32.totalorder %s1156_s27, 0 }
  0x4e   : > { %s1043_s22 = sand.u32 (!%p1163_p7), 1, %s842_s16   ;;  %p1164_p3 = scmp.ne.s32.totalorder (!%p1163_p7), %s1154_s25, 0 }
  0x4f   : > { %212 = sbr.rel (%p1163_p7) target bundleno = 816 (0x330), region = 32  ;;  %s581_s30 = sshll.u32 (!%p1163_p7), %s1043_s22, 3 }
  0x50   : > { %s215_s29 = scalar_lea.sflag (!%p1163_p7), [#allocation4], %s1043_s22  ;;  %s218_s7 = scalar_lea.vmem (!%p1163_p7), [#allocation3], %s581_s30 }
  0x56   : > { %821 = dma.done.wait (%p1164_p3), %s215_s29, 128  }
  0x57   : > { %823 = vsyncadd (%p1164_p3), %s215_s29, 4294967168  ;;  %p1165_p2 = scmp.ne.s32.totalorder %s1152_s23, 0 }
  0x59   : > { %825 = dma.done.wait (%p1165_p2), [#allocation7], 64  }
  0x5a   : > { %827 = vsyncadd (%p1165_p2), [#allocation7], 4294967232  ;;  %v256_v0 = vlaneseq  ;;  %v862_v1 = vmov 1983009808   ;;  %v250_v8 = vld [vmem:[%s218_s7] sm:$0xff]  ;;  %vm273_vm0 = vcmask 1041408  }
  0x5b   : > { %v254_v2 = vunpack.c.l.s4 %v862_v1  ;;  %v252_v9 = vcombine.high %v250_v8, %v250_v8  ;;  %vm307_vm1 = vcmask 1041409   ;;  %vm309_vm2 = vcmask 1042434   ;;  %v326_v48 = vld [vmem:[#allocation6] sm:$0xf]  ;;  %s243_s23 = scalar_lea.vmem [#allocation8], %s1043_s22  ;;  %s585_s13 = sshll.u32 %s850_s18, 4 }
  0x5c   : > { %v257_v3 = vshrl.u32 %v256_v0, 7  ;;  %v330_v4 = vand.u32 127, %v256_v0  ;;  %vm311_vm3 = vcmask 1043459   ;;  %vm321_vm4 = vcmask 1043456   ;;  %v327_v52 = vld [vmem:[%s1145_s2] sm:$0x1]  ;;  %s1067_s6 = scalar_lea.hbm %s1146_s3, %s585_s13 }
  0x5d   : > { %v255_v5 = vunpack.c.0.s8 %v254_v2  ;;  %v863_v47 = vmov 0.0   ;;  %vm864_vm5 = vmmov 0   ;;  %vm335_vm6 = vcmask 31744   ;;  %s445_s11 = sshll.u32 %s243_s23, 4  ;;  %s429_s9 = scalar_lea.sflag [#allocation5], %s1043_s22  ;;  %s446_s11 = int_to_ptr.vmem [resolvable:$true] %s445_s11 }
  0x5e   : > { %v333_v6 = vsub.s32 %v330_v4, %v257_v3  ;;  %591 = vmatprep.subr.mxu0 %v863_v47  ;;  %593 = vmatprep.mubr.msk.f32.mxu0 %vm864_vm5, %v863_v47  ;;  %vm424_vm7 = vcmask 24576   ;;  %vm411_vm8 = vcmask 57344   ;;  %s740_s12 = scalar_lea.vmem %s446_s11, 16  ;;  %s865_s24 = smov [#allocation8]  }
  0x5f   : > { %v258_v7 = vsub.s32 %v255_v5, %v257_v3  ;;  %592 = vmatpush3.msk.msra.mxu0 %vm321_vm4, %v326_v48  ;;  %p741_p11 = scmp.ne.s32.totalorder %s446_s11, %s740_s12  ;;  %s744_s28 = sshll.u32 %s865_s24, 4  ;;  %s745_s28 = int_to_ptr.vmem [resolvable:$false] %s744_s28 }
  0x60   : > { %s746_s30 = scalar_lea.vmem %s745_s28, 32  ;;  %p747_p9 = scmp.lt.s32.totalorder %s446_s11, %s745_s28 }
  0x61   : > { %v259_v10 = vrot.slane %v250_v8, %v258_v7  ;;  %v266_v11 = vrot.slane %v252_v9, %v258_v7  ;;  %p742_p6 = pnand %p741_p11, %p993_p13  ;;  %p748_p12 = scmp.lt.s32.totalorder %s746_s30, %s740_s12 }
  0x63   : > { %v267_v12 = vcombine.high %v259_v10, %v259_v10  ;;  %v274_v13 = vsel %vm273_vm0, %v259_v10, 0.0  ;;  %v268_v15 = vcombine.high %v266_v11, %v266_v11  ;;  %v288_v17 = vsel %vm273_vm0, %v266_v11, 0.0  ;;  %p743_p8 = pneg %p742_p6  ;;  %p749_p0 = por %p748_p12, %p747_p9 }
  0x64   : > { %v275_v14 = vrot.slane %v274_v13, 4  ;;  %v289_v20 = vrot.slane %v288_v17, 4 }
  0x65   : > { %v281_v16 = vsel %vm273_vm0, %v267_v12, 0.0  ;;  %v295_v21 = vsel %vm273_vm0, %v268_v15, 0.0  ;;  %p750_p5 = pnand %p749_p0, %p743_p8 }
  0x66   : > { %v276_v18 = vadd.f32 %v275_v14, %v274_v13  ;;  %v282_v19 = vrot.slane %v281_v16, 4  ;;  %v290_v24 = vadd.f32 %v289_v20, %v288_v17  ;;  %v296_v25 = vrot.slane %v295_v21, 4 }
  0x68   : > { %v277_v22 = vrot.slane %v276_v18, 2  ;;  %v283_v23 = vadd.f32 %v282_v19, %v281_v16  ;;  %v291_v28 = vrot.slane %v290_v24, 2  ;;  %v297_v29 = vadd.f32 %v296_v25, %v295_v21 }
  0x6a   : > { %v278_v26 = vadd.f32 %v277_v22, %v276_v18  ;;  %v284_v27 = vrot.slane %v283_v23, 2  ;;  %v292_v32 = vadd.f32 %v291_v28, %v290_v24  ;;  %v298_v33 = vrot.slane %v297_v29, 2 }
  0x6c   : > { %v279_v30 = vrot.slane %v278_v26, 1  ;;  %v285_v31 = vadd.f32 %v284_v27, %v283_v23  ;;  %v293_v36 = vrot.slane %v292_v32, 1  ;;  %v299_v37 = vadd.f32 %v298_v33, %v297_v29 }
  0x6e   : > { %v280_v34 = vadd.f32 %v279_v30, %v278_v26  ;;  %v286_v35 = vrot.slane %v285_v31, 1  ;;  %v294_v39 = vadd.f32 %v293_v36, %v292_v32  ;;  %v300_v40 = vrot.slane %v299_v37, 1 }
  0x70   : > { %v287_v38 = vadd.f32 %v286_v35, %v285_v31  ;;  %v301_v41 = vadd.f32 %v300_v40, %v299_v37 }
  0x72   : > { %v308_v42 = vsel %vm307_vm1, %v287_v38, %v280_v34 }
  0x73   : > { %v310_v43 = vsel %vm309_vm2, %v294_v39, %v308_v42 }
  0x74   : > { %v312_v44 = vsel %vm311_vm3, %v301_v41, %v310_v43 }
  0x75   : > { %315 = vst [vmem:[#allocation2] sm:$0xf] %v312_v44 }
  0x7c   : > { %v320_v45 = vld [vmem:[#allocation2] sm:$0xf] }
  0x7d   : > { %v322_v46 = vsel %vm321_vm4, %v320_v45, 0.0 }
  0x7e   : > { %323 = vadd.xlane.f32.xlu0 %v322_v46 }
 0x10b   : > { %v324_v49 = vpop.xlane.xlu0 %323 }
 0x10c   : > { %v325_v50 = vmul.f32 0.00390625, %v324_v49 }
 0x10e   : > { %v334_v51 = vrot.slane %v325_v50, %v333_v6 }
 0x110   : > { %594 = vmatmul.mubr.msk.f32.vlgmr.msra.gmra.mrb[0].mxu0 %vm335_vm6, %v334_v51  ;;  %425 = vst.msk [vmem:[%s243_s23] sm:$0x1] %vm424_vm7, %v334_v51 }
 0x1e3   : > { %v407_v53 = vpop.f32.mrb[0].mxu0 }
 0x1e4   : > { %v408_v54 = vadd.f32 %v407_v53, %v327_v52  ;;  %v595_v55 = vpop.f32.mrb[1].mxu0 }
 0x1e6   : > { %v412_v56 = vsel %vm411_vm8, %v408_v54, -inf }
 0x1e7   : > { %413 = vmax.xlane.f32.xlu0 %v412_v56 }
 0x274   : > { %v414_v57 = vpop.xlane.xlu0 %413 }
 0x275   : > { %v415_v58 = vsub.f32 %v408_v54, %v414_v57 }
 0x277   : > { %v416_v59 = vmul.f32 1.442695, %v415_v58 }
 0x279   : > { %678 = vpow2.f32 %v416_v59 }
 0x283   : > { %v679_v60 = vpop.eup %678 }
 0x284   : > { %v418_v61 = vsel %vm411_vm8, %v679_v60, 0.0 }
 0x285   : > { %419 = vadd.xlane.f32.xlu1 %v418_v61 }
 0x286   : > { %753 = shalt.err (!%p750_p5)
}
 0x287   : > { %s754_s29 = scalar_lea.hbm %s1067_s6, 16  ;;  %s758_s25 = scalar_lea.hbm %s1146_s3, 32 }
 0x288   : > { %p755_p10 = scmp.ne.s32.totalorder %s1067_s6, %s754_s29  ;;  %p759_p7 = scmp.lt.u32.totalorder %s1067_s6, %s1146_s3 }
 0x289   : > { %p760_p3 = scmp.lt.u32.totalorder %s758_s25, %s754_s29  ;;  %p762_p11 = scmp.lt.u32.totalorder %s754_s29, %s1067_s6 }
 0x28a   : > { %p756_p4 = pnand %p755_p10, %p993_p13 }
 0x28b   : > { %p761_p2 = por %p760_p3, %p759_p7 }
 0x28c   : > { %p757_p1 = pneg %p756_p4 }
 0x28d   : > { %p763_p6 = por %p762_p11, %p761_p2 }
 0x28f   : > { %p764_p8 = pnand %p763_p6, %p757_p1 }
 0x291   : > { %767 = shalt.err (!%p764_p8)
}
 0x292   : > { %602 = dma.vmem_to_hbm [thread:$0]  (%p993_p13), %s446_s11, 16, %s1067_s6, %s429_s9  }
 0x293   : > { %s249_s21 = scalar_lea.vmem [#allocation9], %s1043_s22  ;;  %s1093_s30 = scalar_lea.hbm %s1147_s4, %s585_s13 }
 0x294   : > { %s458_s12 = sshll.u32 %s249_s21, 4  ;;  %s433_s6 = scalar_lea.sflag [#allocation10], %s1043_s22  ;;  %s1095_s12 = int_to_ptr.vmem [resolvable:$true] %s458_s12 }
 0x295   : > { %s768_s11 = scalar_lea.vmem %s1095_s12, 16  ;;  %s866_s9 = smov [#allocation9]  }
 0x296   : > { %p769_p9 = scmp.ne.s32.totalorder %s1095_s12, %s768_s11  ;;  %s772_s18 = sshll.u32 %s866_s9, 4  ;;  %s773_s18 = int_to_ptr.vmem [resolvable:$false] %s772_s18 }
 0x297   : > { %s774_s29 = scalar_lea.vmem %s773_s18, 32  ;;  %p775_p5 = scmp.lt.s32.totalorder %s1095_s12, %s773_s18 }
 0x298   : > { %p770_p12 = pnand %p769_p9, %p993_p13  ;;  %p776_p10 = scmp.lt.s32.totalorder %s774_s29, %s768_s11 }
 0x29a   : > { %p771_p0 = pneg %p770_p12  ;;  %p777_p4 = por %p776_p10, %p775_p5 }
 0x29c   : > { %p778_p1 = pnand %p777_p4, %p771_p0 }
 0x312   : > { %v420_v62 = vpop.xlane.xlu1 %419 }
 0x313   : > { %680 = vlog2.f32 %v420_v62 }
 0x31d   : > { %v681_v63 = vpop.eup %680 }
 0x31e   : > { %v422_v0 = vmul.f32 0.6931472, %v681_v63 }
 0x320   : > { %v426_v1 = vsub.f32 %v415_v58, %v422_v0 }
 0x322   : > { %427 = vst.msk [vmem:[%s249_s21] sm:$0x1] %vm411_vm8, %v426_v1 }
 0x323   : > { %781 = shalt.err (!%p778_p1)
}
 0x324   : > { %s782_s22 = scalar_lea.hbm %s1093_s30, 16  ;;  %s786_s23 = scalar_lea.hbm %s1147_s4, 32 }
 0x325   : > { %p783_p7 = scmp.ne.s32.totalorder %s1093_s30, %s782_s22  ;;  %p787_p11 = scmp.lt.u32.totalorder %s1093_s30, %s1147_s4 }
 0x326   : > { %p788_p6 = scmp.lt.u32.totalorder %s786_s23, %s782_s22  ;;  %p790_p9 = scmp.lt.u32.totalorder %s782_s22, %s1093_s30 }
 0x327   : > { %p784_p3 = pnand %p783_p7, %p993_p13 }
 0x328   : > { %p789_p8 = por %p788_p6, %p787_p11 }
 0x329   : > { %p785_p2 = pneg %p784_p3 }
 0x32a   : > { %p791_p12 = por %p790_p9, %p789_p8 }
 0x32c   : > { %p792_p0 = pnand %p791_p12, %p785_p2 }
 0x32e   : > { %795 = shalt.err (!%p792_p0)
}
 0x32f   : > { %603 = dma.vmem_to_hbm [thread:$0]  (%p993_p13), %s1095_s12, 16, %s1093_s30, %s433_s6  }
 0x330 PF: > { %s470_s14 = sand.u32 1, %s838_s15   ;;  %p1166_p5 = scmp.ne.s32.totalorder %s1155_s26, 0 }
 0x331   : > { %p1167_p10 = scmp.ge.s32.totalorder %s858_s20, 2  ;;  %s471_s21 = scalar_lea.sflag [#allocation5], %s470_s14 }
 0x333   : > { %p615_p4 = pnand %p1167_p10, %p1166_p5 }
 0x335   : > { %829 = dma.done.wait (!%p615_p4), %s471_s21, 16  }
 0x336   : > { %831 = vsyncadd (!%p615_p4), %s471_s21, 4294967280  ;;  %s479_s24 = scalar_lea.sflag [#allocation10], %s470_s14 }
 0x337   : > { %833 = dma.done.wait (!%p615_p4), %s479_s24, 16  }
 0x338   : > { %835 = vsyncadd (!%p615_p4), %s479_s24, 4294967280  ;;  %s25_s20 = sadd.s32 1, %s858_s20   ;;  %s1168_s15 = smov %s842_s16 }
 0x339   : > { %p22_p1 = scmp.ge.s32.totalorder %s25_s20, 4   ;;  %s1169_s16 = smov %s846_s17 }
 0x33a   : > { %s1170_s17 = smov %s1001_s10  ;;  %s1171_s18 = smov %s854_s19 }
 0x33b   : > { %s1172_s19 = smov %s1174_s5  ;;  %24 = sbr.rel (!%p22_p1) target bundleno = 9 (0x9), region = 103 }
 0x342   :  { %483 = vsyncpa [#allocation4], 1 }
 0x343   :  { %485 = vsyncpa [#allocation4 + $0x1], 1 }
 0x344   :  { %486 = vsyncpa [#allocation7], 1 }
 0x345   :  { %487 = vsyncpa [#allocation5], 1 }
 0x346   :  { %489 = vsyncpa [#allocation5 + $0x1], 1 }
 0x347   :  { %490 = vsyncpa [#allocation10], 1 }
 0x348   :  { %492 = vsyncpa [#allocation10 + $0x1], 1 }

</bundles_post_ra>
